<compile_context>
chip_gen: v7x
topology: tpu7x:2x2x1
jax: 0.10.0
libtpu: 0.0.40
codegen_flags: <defaults>
</compile_context>

<pallas_src>
import math
import jax
import jax.numpy as jnp
from jax.experimental import pallas as pl
from jax.experimental.pallas import tpu as pltpu


def _round_up(x, m):
    return ((x + m - 1) // m) * m


def _pack_factor(d):
    """Smallest p such that p * d is a multiple of a vreg's 128 lanes."""
    return 128 // math.gcd(d, 128)


def ff_kernel(x_ref, w1_ref, b1_ref, w2_ref, b2_ref, w3_ref, b3_ref,
              ws_ref, bs_ref, o_ref):
    """out = relu(relu(relu(x@W1+b1)@W2+b2)@W3+b3) + (x@Ws + bs)

    Runs on one row-tile of (possibly lane-packed) x.  All matmuls hit the
    MXU with f32 accumulation; relu / bias / residual add stay on the VPU.
    """
    x = x_ref[...]

    h = jnp.dot(x, w1_ref[...], preferred_element_type=jnp.float32) + b1_ref[...]
    h = jnp.maximum(h, 0.0)
    h = jnp.dot(h, w2_ref[...], preferred_element_type=jnp.float32) + b2_ref[...]
    h = jnp.maximum(h, 0.0)
    h = jnp.dot(h, w3_ref[...], preferred_element_type=jnp.float32) + b3_ref[...]
    block = jnp.maximum(h, 0.0)

    # Shortcut as a separate small matmul (no mid-vreg lane split needed).
    short = jnp.dot(x, ws_ref[...], preferred_element_type=jnp.float32) + bs_ref[...]

    o_ref[...] = (block + short).astype(o_ref.dtype)


def _choose_row_tile(rows, bytes_per_row, target_tile_bytes):
    """Large VMEM-budgeted tiles; >=2 'parallel' steps when there is enough
    work so both v7x TensorCores are used (no effect on 1-TC v5e/v6e)."""
    tile = max(8, (target_tile_bytes // max(bytes_per_row, 1)) // 8 * 8)
    if rows >= 16:                              # room for two >=8-row tiles
        half = _round_up(-(-rows // 2), 8)
        tile = min(tile, half)
    tile = min(tile, _round_up(rows, 8))
    return max(8, tile)


def ff_forward(x, params, *, storage_dtype=None, target_tile_bytes=2 << 20):
    """FF forward pass.  params = (w1, b1, w2, b2, w3, b3, ws, bs) with
    weights stored (fan_in, fan_out) so forward is x @ W + b."""
    n, d_in = x.shape
    w1, b1, w2, b2, w3, b3, ws, bs = params
    d_out = w1.shape[1]
    out_dtype = storage_dtype if storage_dtype is not None else x.dtype

    # ---- lane-dense row packing ---------------------------------------------
    pa, pb = _pack_factor(d_in), _pack_factor(d_out)
    p = (pa * pb) // math.gcd(pa, pb)
    if p == 1 or p * max(d_in, d_out) > 512:
        p = 1                                    # plain layout fallback

    if p > 1:
        n_pack = _round_up(n, p)
        if n_pack != n:
            x = jnp.pad(x, ((0, n_pack - n), (0, 0)))
        xk = x.reshape(n_pack // p, p * d_in)    # contiguous reshape: free
        eye = jnp.eye(p, dtype=w1.dtype)
        w1k, w2k, w3k, wsk = [jnp.kron(eye, w) for w in (w1, w2, w3, ws)]
        b1k, b2k, b3k, bsk = [jnp.tile(b, p)[None, :] for b in (b1, b2, b3, bs)]
    else:
        n_pack = n
        xk = x
        w1k, w2k, w3k, wsk = w1, w2, w3, ws
        b1k, b2k, b3k, bsk = [b[None, :] for b in (b1, b2, b3, bs)]

    win, wout = p * d_in, p * d_out

    # Optional bf16 storage for the bandwidth-bound path (biases stay f32,
    # accumulation stays f32 inside the kernel).
    if storage_dtype is not None:
        xk = xk.astype(storage_dtype)
        w1k, w2k, w3k, wsk = [w.astype(storage_dtype)
                              for w in (w1k, w2k, w3k, wsk)]

    # ---- row tiling -----------------------------------------------------------
    rows = xk.shape[0]
    bytes_per_row = win * jnp.dtype(xk.dtype).itemsize
    row_tile = _choose_row_tile(rows, bytes_per_row, target_tile_bytes)
    rows_pad = _round_up(rows, row_tile)
    if rows_pad != rows:
        xk = jnp.pad(xk, ((0, rows_pad - rows), (0, 0)))

    full = lambda i: (0, 0)   # weights/biases: same resident block every step

    out = pl.pallas_call(
        ff_kernel,
        out_shape=jax.ShapeDtypeStruct((rows_pad, wout), out_dtype),
        grid=(rows_pad // row_tile,),
        in_specs=[
            pl.BlockSpec((row_tile, win), lambda i: (i, 0)),   # x row tile
            pl.BlockSpec((win, wout), full),                   # W1 (block-diag)
            pl.BlockSpec((1, wout), full),                     # b1
            pl.BlockSpec((wout, wout), full),                  # W2
            pl.BlockSpec((1, wout), full),                     # b2
            pl.BlockSpec((wout, wout), full),                  # W3
            pl.BlockSpec((1, wout), full),                     # b3
            pl.BlockSpec((win, wout), full),                   # Ws (shortcut)
            pl.BlockSpec((1, wout), full),                     # bs
        ],
        out_specs=pl.BlockSpec((row_tile, wout), lambda i: (i, 0)),
        compiler_params=pltpu.CompilerParams(
            dimension_semantics=("parallel",),
            # Raises v5e's 16 MiB scoped default; tile budget above keeps the
            # double-buffered x/out tiles + f32 temporaries well inside this,
            # which also fits v7x's 64 MiB physical VMEM.
            vmem_limit_bytes=32 * 1024 * 1024,
        ),
    )(xk, w1k, b1k, w2k, b2k, w3k, b3k, wsk, bsk)

    out = out[:rows]
    if p > 1:
        out = out.reshape(n_pack, d_out)          # free reshape back
    return out[:n]


def init_linear(key, fan_in, fan_out, dtype=jnp.float32):
    """nn.Linear-style init: U(-1/sqrt(fan_in), 1/sqrt(fan_in)); weight stored
    (fan_in, fan_out) so forward is x @ W + b."""
    kw, kb = jax.random.split(key)
    bound = 1.0 / math.sqrt(fan_in)
    w = jax.random.uniform(kw, (fan_in, fan_out), dtype, minval=-bound, maxval=bound)
    b = jax.random.uniform(kb, (fan_out,), dtype, minval=-bound, maxval=bound)
    return w, b


def ff_reference(x, params):
    w1, b1, w2, b2, w3, b3, ws, bs = params
    h = jnp.maximum(x @ w1 + b1, 0.0)
    h = jnp.maximum(h @ w2 + b2, 0.0)
    h = h @ w3 + b3
    return jnp.maximum(h, 0.0) + (x @ ws + bs)


if __name__ == "__main__":
    in_feats, out_feats = 32, 32
    n_rows = 16   # batch of node/graph embeddings (no multiple-of-tile requirement)

    key = jax.random.PRNGKey(0)
    kx, k1, k2, k3, ks = jax.random.split(key, 5)

    x = jax.random.normal(kx, (n_rows, in_feats), jnp.float32)

    w1, b1 = init_linear(k1, in_feats, out_feats)    # block layer 1
    w2, b2 = init_linear(k2, out_feats, out_feats)   # block layer 2
    w3, b3 = init_linear(k3, out_feats, out_feats)   # block layer 3
    ws, bs = init_linear(ks, in_feats, out_feats)    # shortcut
    params = (w1, b1, w2, b2, w3, b3, ws, bs)

    out = ff_forward(x, params)                      # f32 path for tight tolerance
    out = jax.block_until_ready(out)

    ref = ff_reference(x, params)
    assert out.shape == (n_rows, out_feats)
    assert jnp.allclose(out, ref, atol=1e-5, rtol=1e-5), "mismatch vs reference"

    print("KERNEL_OK")
</pallas_src>

<mosaic_0001>
module attributes {stable_mosaic.version = 11 : i64} {
  func.func @ff_kernel(%arg0: i32, %arg1: memref<8x128xf32, #tpu.memory_space<vmem>>, %arg2: memref<128x128xf32, #tpu.memory_space<vmem>>, %arg3: memref<1x128xf32, #tpu.memory_space<vmem>>, %arg4: memref<128x128xf32, #tpu.memory_space<vmem>>, %arg5: memref<1x128xf32, #tpu.memory_space<vmem>>, %arg6: memref<128x128xf32, #tpu.memory_space<vmem>>, %arg7: memref<1x128xf32, #tpu.memory_space<vmem>>, %arg8: memref<128x128xf32, #tpu.memory_space<vmem>>, %arg9: memref<1x128xf32, #tpu.memory_space<vmem>>, %arg10: memref<8x128xf32, #tpu.memory_space<vmem>>) attributes {dimension_semantics = [#tpu.dimension_semantics<parallel>], iteration_bounds = array<i64: 1>, scalar_prefetch = 0 : i64, scratch_operands = 0 : i64, tpu.core_type = #tpu.core_type<tc>, window_params = [{transform_indices = @transform_0, window_bounds = array<i64: 8, 128>}, {pipeline_mode = #tpu.pipeline_mode<synchronous>, transform_indices = @transform_1, window_bounds = array<i64: 128, 128>}, {pipeline_mode = #tpu.pipeline_mode<synchronous>, transform_indices = @transform_2, window_bounds = array<i64: 1, 128>}, {pipeline_mode = #tpu.pipeline_mode<synchronous>, transform_indices = @transform_3, window_bounds = array<i64: 128, 128>}, {pipeline_mode = #tpu.pipeline_mode<synchronous>, transform_indices = @transform_4, window_bounds = array<i64: 1, 128>}, {pipeline_mode = #tpu.pipeline_mode<synchronous>, transform_indices = @transform_5, window_bounds = array<i64: 128, 128>}, {pipeline_mode = #tpu.pipeline_mode<synchronous>, transform_indices = @transform_6, window_bounds = array<i64: 1, 128>}, {pipeline_mode = #tpu.pipeline_mode<synchronous>, transform_indices = @transform_7, window_bounds = array<i64: 128, 128>}, {pipeline_mode = #tpu.pipeline_mode<synchronous>, transform_indices = @transform_8, window_bounds = array<i64: 1, 128>}, {transform_indices = @transform_9, window_bounds = array<i64: 8, 128>}]} {
    %c0 = arith.constant 0 : index
    %c0_0 = arith.constant 0 : index
    %0 = vector.load %arg1[%c0, %c0_0] : memref<8x128xf32, #tpu.memory_space<vmem>>, vector<8x128xf32>
    %c0_1 = arith.constant 0 : index
    %c0_2 = arith.constant 0 : index
    %1 = vector.load %arg2[%c0_1, %c0_2] : memref<128x128xf32, #tpu.memory_space<vmem>>, vector<128x128xf32>
    %cst = arith.constant dense<0.000000e+00> : vector<8x128xf32>
    %2 = tpu.matmul %0, %1, %cst {dimension_numbers = #tpu.dot_dimension_numbers<[1], [0], [0], [1], [0, 0, 1, 1], [], []>} : vector<8x128xf32>, vector<128x128xf32>, vector<8x128xf32> -> vector<8x128xf32>
    %c0_3 = arith.constant 0 : index
    %c0_4 = arith.constant 0 : index
    %3 = vector.load %arg3[%c0_3, %c0_4] : memref<1x128xf32, #tpu.memory_space<vmem>>, vector<1x128xf32>
    %4 = vector.broadcast %3 : vector<1x128xf32> to vector<8x128xf32>
    %5 = arith.addf %2, %4 : vector<8x128xf32>
    %cst_5 = arith.constant 0.000000e+00 : f32
    %6 = vector.broadcast %cst_5 : f32 to vector<8x128xf32>
    %7 = arith.maximumf %5, %6 : vector<8x128xf32>
    %c0_6 = arith.constant 0 : index
    %c0_7 = arith.constant 0 : index
    %8 = vector.load %arg4[%c0_6, %c0_7] : memref<128x128xf32, #tpu.memory_space<vmem>>, vector<128x128xf32>
    %cst_8 = arith.constant dense<0.000000e+00> : vector<8x128xf32>
    %9 = tpu.matmul %7, %8, %cst_8 {dimension_numbers = #tpu.dot_dimension_numbers<[1], [0], [0], [1], [0, 0, 1, 1], [], []>} : vector<8x128xf32>, vector<128x128xf32>, vector<8x128xf32> -> vector<8x128xf32>
    %c0_9 = arith.constant 0 : index
    %c0_10 = arith.constant 0 : index
    %10 = vector.load %arg5[%c0_9, %c0_10] : memref<1x128xf32, #tpu.memory_space<vmem>>, vector<1x128xf32>
    %11 = vector.broadcast %10 : vector<1x128xf32> to vector<8x128xf32>
    %12 = arith.addf %9, %11 : vector<8x128xf32>
    %cst_11 = arith.constant 0.000000e+00 : f32
    %13 = vector.broadcast %cst_11 : f32 to vector<8x128xf32>
    %14 = arith.maximumf %12, %13 : vector<8x128xf32>
    %c0_12 = arith.constant 0 : index
    %c0_13 = arith.constant 0 : index
    %15 = vector.load %arg6[%c0_12, %c0_13] : memref<128x128xf32, #tpu.memory_space<vmem>>, vector<128x128xf32>
    %cst_14 = arith.constant dense<0.000000e+00> : vector<8x128xf32>
    %16 = tpu.matmul %14, %15, %cst_14 {dimension_numbers = #tpu.dot_dimension_numbers<[1], [0], [0], [1], [0, 0, 1, 1], [], []>} : vector<8x128xf32>, vector<128x128xf32>, vector<8x128xf32> -> vector<8x128xf32>
    %c0_15 = arith.constant 0 : index
    %c0_16 = arith.constant 0 : index
    %17 = vector.load %arg7[%c0_15, %c0_16] : memref<1x128xf32, #tpu.memory_space<vmem>>, vector<1x128xf32>
    %18 = vector.broadcast %17 : vector<1x128xf32> to vector<8x128xf32>
    %19 = arith.addf %16, %18 : vector<8x128xf32>
    %cst_17 = arith.constant 0.000000e+00 : f32
    %20 = vector.broadcast %cst_17 : f32 to vector<8x128xf32>
    %21 = arith.maximumf %19, %20 : vector<8x128xf32>
    %c0_18 = arith.constant 0 : index
    %c0_19 = arith.constant 0 : index
    %22 = vector.load %arg8[%c0_18, %c0_19] : memref<128x128xf32, #tpu.memory_space<vmem>>, vector<128x128xf32>
    %cst_20 = arith.constant dense<0.000000e+00> : vector<8x128xf32>
    %23 = tpu.matmul %0, %22, %cst_20 {dimension_numbers = #tpu.dot_dimension_numbers<[1], [0], [0], [1], [0, 0, 1, 1], [], []>} : vector<8x128xf32>, vector<128x128xf32>, vector<8x128xf32> -> vector<8x128xf32>
    %c0_21 = arith.constant 0 : index
    %c0_22 = arith.constant 0 : index
    %24 = vector.load %arg9[%c0_21, %c0_22] : memref<1x128xf32, #tpu.memory_space<vmem>>, vector<1x128xf32>
    %25 = vector.broadcast %24 : vector<1x128xf32> to vector<8x128xf32>
    %26 = arith.addf %23, %25 : vector<8x128xf32>
    %27 = arith.addf %21, %26 : vector<8x128xf32>
    %c0_23 = arith.constant 0 : index
    %c0_24 = arith.constant 0 : index
    %28 = vector.load %arg10[%c0_23, %c0_24] : memref<8x128xf32, #tpu.memory_space<vmem>>, vector<8x128xf32>
    tpu.vector_store %arg10[%c0_23, %c0_24], %27 {strides = array<i32>} : memref<8x128xf32, #tpu.memory_space<vmem>>, vector<8x128xf32>,
    return
  }
  func.func @transform_0(%arg0: i32) -> (i32, i32) {
    %c0_i32 = arith.constant 0 : i32
    %c0_i32_0 = arith.constant 0 : i32
    return %arg0, %c0_i32 : i32, i32
  }
  func.func @transform_1(%arg0: i32) -> (i32, i32) {
    %c0_i32 = arith.constant 0 : i32
    %c0_i32_0 = arith.constant 0 : i32
    %c0_i32_1 = arith.constant 0 : i32
    return %c0_i32, %c0_i32_0 : i32, i32
  }
  func.func @transform_2(%arg0: i32) -> (i32, i32) {
    %c0_i32 = arith.constant 0 : i32
    %c0_i32_0 = arith.constant 0 : i32
    %c0_i32_1 = arith.constant 0 : i32
    return %c0_i32, %c0_i32_0 : i32, i32
  }
  func.func @transform_3(%arg0: i32) -> (i32, i32) {
    %c0_i32 = arith.constant 0 : i32
    %c0_i32_0 = arith.constant 0 : i32
    %c0_i32_1 = arith.constant 0 : i32
    return %c0_i32, %c0_i32_0 : i32, i32
  }
  func.func @transform_4(%arg0: i32) -> (i32, i32) {
    %c0_i32 = arith.constant 0 : i32
    %c0_i32_0 = arith.constant 0 : i32
    %c0_i32_1 = arith.constant 0 : i32
    return %c0_i32, %c0_i32_0 : i32, i32
  }
  func.func @transform_5(%arg0: i32) -> (i32, i32) {
    %c0_i32 = arith.constant 0 : i32
    %c0_i32_0 = arith.constant 0 : i32
    %c0_i32_1 = arith.constant 0 : i32
    return %c0_i32, %c0_i32_0 : i32, i32
  }
  func.func @transform_6(%arg0: i32) -> (i32, i32) {
    %c0_i32 = arith.constant 0 : i32
    %c0_i32_0 = arith.constant 0 : i32
    %c0_i32_1 = arith.constant 0 : i32
    return %c0_i32, %c0_i32_0 : i32, i32
  }
  func.func @transform_7(%arg0: i32) -> (i32, i32) {
    %c0_i32 = arith.constant 0 : i32
    %c0_i32_0 = arith.constant 0 : i32
    %c0_i32_1 = arith.constant 0 : i32
    return %c0_i32, %c0_i32_0 : i32, i32
  }
  func.func @transform_8(%arg0: i32) -> (i32, i32) {
    %c0_i32 = arith.constant 0 : i32
    %c0_i32_0 = arith.constant 0 : i32
    %c0_i32_1 = arith.constant 0 : i32
    return %c0_i32, %c0_i32_0 : i32, i32
  }
  func.func @transform_9(%arg0: i32) -> (i32, i32) {
    %c0_i32 = arith.constant 0 : i32
    %c0_i32_0 = arith.constant 0 : i32
    return %arg0, %c0_i32 : i32, i32
  }
}

</mosaic_0001>

<bundles_post_ra>
// kernel: tpu_custom_call.1
= control target key start
LH: loop header
LB: loop body
LE: loop exit
PB: predicated region body
PF: predicated region fallthrough
CT: control target
= control target key end

     0   :  { %14 = vsyncpa [#allocation3], 0  ;;  %s1154_s0 = inlined_call_operand.hbm [shape: f32[8,128], index: 0, kind: input, shape index: {}]   ;;  %s1155_s1 = inlined_call_operand.hbm [shape: f32[128,128], index: 1, kind: input, shape index: {}]   ;;  %s1156_s2 = inlined_call_operand.vmem [shape: f32[1,128], index: 2, kind: input, shape index: {}]   ;;  %s1157_s3 = inlined_call_operand.hbm [shape: f32[128,128], index: 3, kind: input, shape index: {}]   ;;  %s1158_s4 = inlined_call_operand.vmem [shape: f32[1,128], index: 4, kind: input, shape index: {}]   ;;  %s1159_s5 = inlined_call_operand.hbm [shape: f32[128,128], index: 5, kind: input, shape index: {}]   ;;  %s1160_s6 = inlined_call_operand.vmem [shape: f32[1,128], index: 6, kind: input, shape index: {}]   ;;  %s1161_s7 = inlined_call_operand.hbm [shape: f32[128,128], index: 7, kind: input, shape index: {}]   ;;  %s1162_s8 = inlined_call_operand.vmem [shape: f32[1,128], index: 8, kind: input, shape index: {}]   ;;  %s1163_s9 = inlined_call_operand.hbm [shape: f32[8,128], index: 9, kind: output, shape index: {}]  }
   0x1   :  { %15 = vsyncpa [#allocation6], 0 }
   0x2   :  { %16 = vsyncpa [#allocation9], 0 }
   0x3   :  { %17 = vsyncpa [#allocation4], 0  ;;  %s953_s30 = smov [#allocation5]   ;;  %s813_s13 = scalar_lea.hbm %s1155_s1, 2048 }
   0x4   :  { %s33_s10 = sshll.u32 %s953_s30, 4  ;;  %p814_p0 = scmp.ne.s32.totalorder %s1155_s1, %s813_s13  ;;  %s34_s10 = int_to_ptr.vmem [resolvable:$true] %s33_s10 }
   0x5   :  { %p817_p1 = scmp.lt.u32.totalorder %s813_s13, %s1155_s1 }
   0x7   :  { %p819_p2 = pnand %p817_p1, %p814_p0 }
   0x9   :  { %822 = shalt.err (!%p819_p2)
}
   0xa   :  { %s823_s18 = scalar_lea.vmem %s34_s10, 2048  ;;  %p828_p4 = scmp.lt.s32.totalorder %s34_s10, %s34_s10 }
   0xb   :  { %p824_p3 = scmp.ne.s32.totalorder %s34_s10, %s823_s18  ;;  %p829_p5 = scmp.lt.s32.totalorder %s823_s18, %s823_s18 }
   0xd   :  { %p830_p6 = por %p829_p5, %p828_p4 }
   0xf   :  { %p831_p7 = pnand %p830_p6, %p824_p3 }
  0x11   :  { %834 = shalt.err (!%p831_p7)
}
  0x12   :  { %s954_s19 = smov 128   ;;  %s955_s20 = smov 8  }
  0x13   :  { %39 = dma.hbm_to_vmem [thread:$0]  %s1155_s1, 2048, %s34_s10, [#allocation6], %s954_s19, %s954_s19, %s955_s20  }
  0x14   :  { %s956_s23 = smov [#allocation8]   ;;  %s957_s25 = smov [#allocation2]  }
  0x15   :  { %s61_s24 = sshll.u32 %s956_s23, 4  ;;  %s24_s26 = sshll.u32 %s957_s25, 4  ;;  %s62_s24 = int_to_ptr.vmem [resolvable:$true] %s61_s24  ;;  %s25_s26 = int_to_ptr.vmem [resolvable:$true] %s24_s26 }
  0x16   :  { %s835_s29 = scalar_lea.hbm %s1159_s5, 2048 }
  0x17   :  { %p836_p8 = scmp.ne.s32.totalorder %s1159_s5, %s835_s29  ;;  %p839_p9 = scmp.lt.u32.totalorder %s835_s29, %s1159_s5 }
  0x19   :  { %p841_p10 = pnand %p839_p9, %p836_p8 }
  0x1b   :  { %844 = shalt.err (!%p841_p10)
}
  0x1c   :  { %s845_s1 = scalar_lea.vmem %s62_s24, 2048  ;;  %p850_p12 = scmp.lt.s32.totalorder %s62_s24, %s62_s24 }
  0x1d   :  { %p846_p11 = scmp.ne.s32.totalorder %s62_s24, %s845_s1  ;;  %p851_p13 = scmp.lt.s32.totalorder %s845_s1, %s845_s1 }
  0x1f   :  { %p852_p0 = por %p851_p13, %p850_p12 }
  0x21   :  { %p853_p1 = pnand %p852_p0, %p846_p11 }
  0x23   :  { %856 = shalt.err (!%p853_p1)
}
  0x24   :  { %67 = dma.hbm_to_vmem [thread:$0]  %s1159_s5, 2048, %s62_s24, [#allocation9], %s954_s19, %s954_s19, %s955_s20  }
  0x25   :  { %s857_s17 = scalar_lea.hbm %s1154_s0, 128 }
  0x26   :  { %p858_p2 = scmp.ne.s32.totalorder %s1154_s0, %s857_s17  ;;  %p861_p3 = scmp.lt.u32.totalorder %s857_s17, %s1154_s0 }
  0x28   :  { %p863_p4 = pnand %p861_p3, %p858_p2 }
  0x2a   :  { %866 = shalt.err (!%p863_p4)
}
  0x2b   :  { %s867_s25 = scalar_lea.vmem %s25_s26, 128  ;;  %p872_p6 = scmp.lt.s32.totalorder %s25_s26, %s25_s26 }
  0x2c   :  { %p868_p5 = scmp.ne.s32.totalorder %s25_s26, %s867_s25  ;;  %p873_p7 = scmp.lt.s32.totalorder %s867_s25, %s867_s25 }
  0x2e   :  { %p874_p8 = por %p873_p7, %p872_p6 }
  0x30   :  { %p875_p9 = pnand %p874_p8, %p868_p5 }
  0x32   :  { %878 = shalt.err (!%p875_p9)
}
  0x33   :  { %27 = dma.hbm_to_vmem [thread:$0]  %s1154_s0, 128, %s25_s26, [#allocation3]  }
  0x34   :  { %s958_s27 = smov [#allocation7]   ;;  %s959_s29 = smov [#allocation10]  }
  0x35   :  { %s47_s28 = sshll.u32 %s958_s27, 4  ;;  %s75_s30 = sshll.u32 %s959_s29, 4  ;;  %s48_s28 = int_to_ptr.vmem [resolvable:$true] %s47_s28  ;;  %s76_s30 = int_to_ptr.vmem [resolvable:$true] %s75_s30 }
  0x36   :  { %s879_s13 = scalar_lea.hbm %s1157_s3, 2048 }
  0x37   :  { %p880_p10 = scmp.ne.s32.totalorder %s1157_s3, %s879_s13  ;;  %p883_p11 = scmp.lt.u32.totalorder %s879_s13, %s1157_s3 }
  0x39   :  { %p885_p12 = pnand %p883_p11, %p880_p10 }
  0x3b   :  { %888 = shalt.err (!%p885_p12)
}
  0x3c   :  { %s889_s0 = scalar_lea.vmem %s48_s28, 2048  ;;  %p894_p0 = scmp.lt.s32.totalorder %s48_s28, %s48_s28 }
  0x3d   :  { %p890_p13 = scmp.ne.s32.totalorder %s48_s28, %s889_s0  ;;  %p895_p1 = scmp.lt.s32.totalorder %s889_s0, %s889_s0 }
  0x3f   :  { %p896_p2 = por %p895_p1, %p894_p0 }
  0x41   :  { %p897_p3 = pnand %p896_p2, %p890_p13 }
  0x43   :  { %900 = shalt.err (!%p897_p3)
}
  0x44   :  { %53 = dma.hbm_to_vmem [thread:$0]  %s1157_s3, 2048, %s48_s28, [#allocation6], %s954_s19, %s954_s19, %s955_s20  }
  0x45   :  { %s901_s21 = scalar_lea.hbm %s1161_s7, 2048 }
  0x46   :  { %p902_p4 = scmp.ne.s32.totalorder %s1161_s7, %s901_s21  ;;  %p905_p5 = scmp.lt.u32.totalorder %s901_s21, %s1161_s7 }
  0x48   :  { %p907_p6 = pnand %p905_p5, %p902_p4 }
  0x4a   :  { %910 = shalt.err (!%p907_p6)
}
  0x4b   :  { %s911_s24 = scalar_lea.vmem %s76_s30, 2048  ;;  %p916_p8 = scmp.lt.s32.totalorder %s76_s30, %s76_s30 }
  0x4c   :  { %p912_p7 = scmp.ne.s32.totalorder %s76_s30, %s911_s24  ;;  %p917_p9 = scmp.lt.s32.totalorder %s911_s24, %s911_s24 }
  0x4e   :  { %p918_p10 = por %p917_p9, %p916_p8 }
  0x50   :  { %p919_p11 = pnand %p918_p10, %p912_p7 }
  0x52   :  { %922 = shalt.err (!%p919_p11)
}
  0x53   :  { %81 = dma.hbm_to_vmem [thread:$0]  %s1161_s7, 2048, %s76_s30, [#allocation9], %s954_s19, %s954_s19, %s955_s20  }
  0x54   :  { %945 = dma.done.wait [#allocation3], 128  }
  0x55   :  { %946 = vsyncadd [#allocation3], 4294967168 }
  0x56   :  { %947 = dma.done.wait [#allocation6], 4096  }
  0x57   :  { %948 = vsyncadd [#allocation6], 4294963200 }
  0x58   :  { %949 = dma.done.wait [#allocation9], 4096  }
  0x59   :  { %950 = vsyncadd [#allocation9], 4294963200  ;;  %v960_v0 = vmov 0.0|0.0   ;;  %vm961_vm0 = vmmov 0   ;;  %v962_v1 = vmov 0.0   ;;  %v100_v2 = vld [vmem:[#allocation5] sm:$0xff] }
  0x5a   :  { %706 = vmatprep.subr.bf16.mxu0 %v960_v0  ;;  %598 = vmatprep.mubr.msk.f32.mxu0 %vm961_vm0, %v962_v1  ;;  %v101_v3 = vld [vmem:[#allocation5 + $0x8] sm:$0xff]  ;;  %v102_v4 = vld [vmem:[#allocation5 + $0x10] sm:$0xff]  ;;  %v103_v6 = vld [vmem:[#allocation5 + $0x18] sm:$0xff] }
  0x5b   :  { %730 = vmatprep.subr.bf16.mxu1 %v960_v0  ;;  %633 = vmatprep.mubr.msk.f32.mxu1 %vm961_vm0, %v962_v1  ;;  %v707_v5 = vpack.c.bf16 %v101_v3, %v100_v2  ;;  %v710_v7 = vpack.c.bf16 %v103_v6, %v102_v4  ;;  %v104_v8 = vld [vmem:[#allocation5 + $0x20] sm:$0xff]  ;;  %v105_v9 = vld [vmem:[#allocation5 + $0x28] sm:$0xff]  ;;  %v196_v12 = vld [vmem:[#allocation7 + $0x10] sm:$0xff] }
  0x5c   :  { %v194_v10 = vld [vmem:[#allocation7] sm:$0xff]  ;;  %v195_v11 = vld [vmem:[#allocation7 + $0x8] sm:$0xff]  ;;  %v197_v13 = vld [vmem:[#allocation7 + $0x18] sm:$0xff]  ;;  %v713_v14 = vpack.c.bf16 %v105_v9, %v104_v8 }
  0x5d   :  { %708 = vmatpush3.bf16.msra.mxu0 %v707_v5  ;;  %v731_v15 = vpack.c.bf16 %v195_v11, %v194_v10  ;;  %v106_v16 = vld [vmem:[#allocation5 + $0x30] sm:$0xff]  ;;  %v107_v17 = vld [vmem:[#allocation5 + $0x38] sm:$0xff]  ;;  %v734_v18 = vpack.c.bf16 %v197_v13, %v196_v12  ;;  %v198_v19 = vld [vmem:[#allocation7 + $0x20] sm:$0xff] }
  0x5e   :  { %709 = vmatprep.subr.bf16.mxu0 %v960_v0  ;;  %v199_v20 = vld [vmem:[#allocation7 + $0x28] sm:$0xff]  ;;  %v716_v21 = vpack.c.bf16 %v107_v17, %v106_v16  ;;  %v108_v22 = vld [vmem:[#allocation5 + $0x40] sm:$0xff]  ;;  %v200_v25 = vld [vmem:[#allocation7 + $0x30] sm:$0xff] }
  0x5f   :  { %732 = vmatpush3.bf16.msra.mxu1 %v731_v15  ;;  %v109_v23 = vld [vmem:[#allocation5 + $0x48] sm:$0xff]  ;;  %v737_v24 = vpack.c.bf16 %v199_v20, %v198_v19  ;;  %v201_v26 = vld [vmem:[#allocation7 + $0x38] sm:$0xff]  ;;  %v110_v28 = vld [vmem:[#allocation5 + $0x50] sm:$0xff] }
  0x60   :  { %733 = vmatprep.subr.bf16.mxu1 %v960_v0  ;;  %v719_v27 = vpack.c.bf16 %v109_v23, %v108_v22  ;;  %v111_v29 = vld [vmem:[#allocation5 + $0x58] sm:$0xff]  ;;  %v740_v30 = vpack.c.bf16 %v201_v26, %v200_v25  ;;  %v202_v31 = vld [vmem:[#allocation7 + $0x40] sm:$0xff]  ;;  %v203_v32 = vld [vmem:[#allocation7 + $0x48] sm:$0xff] }
  0x61   :  { %711 = vmatpush3.bf16.msra.mxu0 %v710_v7  ;;  %v722_v33 = vpack.c.bf16 %v111_v29, %v110_v28  ;;  %v112_v34 = vld [vmem:[#allocation5 + $0x60] sm:$0xff]  ;;  %v113_v35 = vld [vmem:[#allocation5 + $0x68] sm:$0xff]  ;;  %v743_v36 = vpack.c.bf16 %v203_v32, %v202_v31  ;;  %v204_v37 = vld [vmem:[#allocation7 + $0x50] sm:$0xff] }
  0x62   :  { %712 = vmatprep.subr.bf16.mxu0 %v960_v0  ;;  %v205_v38 = vld [vmem:[#allocation7 + $0x58] sm:$0xff]  ;;  %v725_v39 = vpack.c.bf16 %v113_v35, %v112_v34  ;;  %v114_v40 = vld [vmem:[#allocation5 + $0x70] sm:$0xff]  ;;  %v206_v43 = vld [vmem:[#allocation7 + $0x60] sm:$0xff] }
  0x63   :  { %735 = vmatpush3.bf16.msra.mxu1 %v734_v18  ;;  %v115_v41 = vld [vmem:[#allocation5 + $0x78] sm:$0xff]  ;;  %v746_v42 = vpack.c.bf16 %v205_v38, %v204_v37  ;;  %v207_v44 = vld [vmem:[#allocation7 + $0x68] sm:$0xff]  ;;  %v208_v48 = vld [vmem:[#allocation7 + $0x70] sm:$0xff] }
  0x64   :  { %736 = vmatprep.subr.bf16.mxu1 %v960_v0  ;;  %v728_v45 = vpack.c.bf16 %v115_v41, %v114_v40  ;;  %v749_v46 = vpack.c.bf16 %v207_v44, %v206_v43  ;;  %v1105_v47 = vld [vmem:[#allocation2] sm:$0xff]  ;;  %v288_v51 = vld [vmem:[#allocation8] sm:$0xff]  ;;  %v289_v52 = vld [vmem:[#allocation8 + $0x8] sm:$0xff] }
  0x65   :  { %714 = vmatpush3.bf16.msra.mxu0 %v713_v14  ;;  %v209_v49 = vld [vmem:[#allocation7 + $0x78] sm:$0xff]  ;;  %v755_v53 = vpack.c.bf16 %v289_v52, %v288_v51  ;;  %v290_v54 = vld [vmem:[#allocation8 + $0x10] sm:$0xff]  ;;  %v292_v57 = vld [vmem:[#allocation8 + $0x20] sm:$0xff] }
  0x66   :  { %715 = vmatprep.subr.bf16.mxu0 %v960_v0  ;;  %v752_v50 = vpack.c.bf16 %v209_v49, %v208_v48  ;;  %v291_v55 = vld [vmem:[#allocation8 + $0x18] sm:$0xff]  ;;  %v293_v58 = vld [vmem:[#allocation8 + $0x28] sm:$0xff]  ;;  %v294_v60 = vld [vmem:[#allocation8 + $0x30] sm:$0xff] }
  0x67   :  { %738 = vmatpush3.bf16.msra.mxu1 %v737_v24  ;;  %v758_v56 = vpack.c.bf16 %v291_v55, %v290_v54  ;;  %v761_v59 = vpack.c.bf16 %v293_v58, %v292_v57  ;;  %v295_v61 = vld [vmem:[#allocation8 + $0x38] sm:$0xff]  ;;  %v296_v63 = vld [vmem:[#allocation8 + $0x40] sm:$0xff]  ;;  %v297_v2 = vld [vmem:[#allocation8 + $0x48] sm:$0xff] }
  0x68   :  { %739 = vmatprep.subr.bf16.mxu1 %v960_v0  ;;  %v764_v62 = vpack.c.bf16 %v295_v61, %v294_v60  ;;  %v767_v3 = vpack.c.bf16 %v297_v2, %v296_v63  ;;  %v298_v4 = vld [vmem:[#allocation8 + $0x50] sm:$0xff]  ;;  %v299_v5 = vld [vmem:[#allocation8 + $0x58] sm:$0xff]  ;;  %v300_v7 = vld [vmem:[#allocation8 + $0x60] sm:$0xff] }
  0x69   :  { %717 = vmatpush3.bf16.msra.mxu0 %v716_v21  ;;  %v770_v6 = vpack.c.bf16 %v299_v5, %v298_v4  ;;  %v301_v8 = vld [vmem:[#allocation8 + $0x68] sm:$0xff]  ;;  %v494_v10 = vld [vmem:[%s1156_s2] ss:$0 sm:$0xff]  ;;  %v382_v11 = vld [vmem:[#allocation10] sm:$0xff] }
  0x6a   :  { %718 = vmatprep.subr.bf16.mxu0 %v960_v0  ;;  %v773_v9 = vpack.c.bf16 %v301_v8, %v300_v7  ;;  %v383_v12 = vld [vmem:[#allocation10 + $0x8] sm:$0xff]  ;;  %v384_v18 = vld [vmem:[#allocation10 + $0x10] sm:$0xff]  ;;  %v385_v19 = vld [vmem:[#allocation10 + $0x18] sm:$0xff] }
  0x6b   :  { %741 = vmatpush3.bf16.msra.mxu1 %v740_v30  ;;  %v779_v16 = vpack.c.bf16 %v383_v12, %v382_v11  ;;  %v782_v20 = vpack.c.bf16 %v385_v19, %v384_v18  ;;  %v386_v21 = vld [vmem:[#allocation10 + $0x20] sm:$0xff]  ;;  %v387_v22 = vld [vmem:[#allocation10 + $0x28] sm:$0xff]  ;;  %v388_v24 = vld [vmem:[#allocation10 + $0x30] sm:$0xff] }
  0x6c   :  { %742 = vmatprep.subr.bf16.mxu1 %v960_v0  ;;  %v785_v23 = vpack.c.bf16 %v387_v22, %v386_v21  ;;  %v389_v25 = vld [vmem:[#allocation10 + $0x38] sm:$0xff]  ;;  %v391_v28 = vld [vmem:[#allocation10 + $0x48] sm:$0xff]  ;;  %v394_v32 = vld [vmem:[#allocation10 + $0x60] sm:$0xff] }
  0x6d   :  { %720 = vmatpush3.bf16.msra.mxu0 %v719_v27  ;;  %v788_v26 = vpack.c.bf16 %v389_v25, %v388_v24  ;;  %v390_v27 = vld [vmem:[#allocation10 + $0x40] sm:$0xff]  ;;  %v393_v30 = vld [vmem:[#allocation10 + $0x58] sm:$0xff]  ;;  %v302_v35 = vld [vmem:[#allocation8 + $0x70] sm:$0xff] }
  0x6e   :  { %721 = vmatprep.subr.bf16.mxu0 %v960_v0  ;;  %v791_v29 = vpack.c.bf16 %v391_v28, %v390_v27  ;;  %v396_v38 = vld [vmem:[#allocation10 + $0x70] sm:$0xff]  ;;  %v495_v41 = vld [vmem:[%s1158_s4] ss:$0 sm:$0xff]  ;;  %s963_s4 = smov [#allocation11]  }
  0x6f   :  { %744 = vmatpush3.bf16.msra.mxu1 %v743_v36  ;;  %v303_v36 = vld [vmem:[#allocation8 + $0x78] sm:$0xff]  ;;  %s483_s12 = sshll.u32 %s963_s4, 4  ;;  %s484_s12 = int_to_ptr.vmem [resolvable:$true] %s483_s12 }
  0x70   :  { %745 = vmatprep.subr.bf16.mxu1 %v960_v0  ;;  %v776_v37 = vpack.c.bf16 %v303_v36, %v302_v35  ;;  %v496_v48 = vld [vmem:[%s1160_s6] ss:$0 sm:$0xff]  ;;  %s923_s13 = scalar_lea.vmem %s484_s12, 128  ;;  %p928_p13 = scmp.lt.s32.totalorder %s484_s12, %s484_s12 }
  0x71   :  { %723 = vmatpush3.bf16.msra.mxu0 %v722_v33  ;;  %v395_v33 = vld [vmem:[#allocation10 + $0x68] sm:$0xff]  ;;  %v497_v49 = vld [vmem:[%s1162_s8] ss:$0 sm:$0xff]  ;;  %p924_p12 = scmp.ne.s32.totalorder %s484_s12, %s923_s13  ;;  %p929_p0 = scmp.lt.s32.totalorder %s923_s13, %s923_s13 }
  0x72   :  { %724 = vmatprep.subr.bf16.mxu0 %v960_v0  ;;  %v797_v34 = vpack.c.bf16 %v395_v33, %v394_v32 }
  0x73   :  { %747 = vmatpush3.bf16.msra.mxu1 %v746_v42  ;;  %p930_p1 = por %p929_p0, %p928_p13 }
  0x74   :  { %748 = vmatprep.subr.bf16.mxu1 %v960_v0 }
  0x75   :  { %726 = vmatpush3.bf16.msra.mxu0 %v725_v39  ;;  %v397_v39 = vld [vmem:[#allocation10 + $0x78] sm:$0xff]  ;;  %p931_p2 = pnand %p930_p1, %p924_p12 }
  0x76   :  { %727 = vmatprep.subr.bf16.mxu0 %v960_v0  ;;  %v800_v40 = vpack.c.bf16 %v397_v39, %v396_v38 }
  0x77   :  { %750 = vmatpush3.bf16.msra.mxu1 %v749_v46 }
  0x78   :  { %751 = vmatprep.subr.bf16.mxu1 %v960_v0 }
  0x79   :  { %729 = vmatpush3.bf16.msra.mxu0 %v728_v45 }
  0x7a   :  { %754 = vmatprep.subr.bf16.mxu0 %v960_v0 }
  0x7b   :  { %753 = vmatpush3.bf16.msra.mxu1 %v752_v50 }
  0x7c   :  { %599 = vmatmul.mubr.f32.vlgmr.msra.gmra.mrb[0].mxu0 %v1105_v47  ;;  %778 = vmatprep.subr.bf16.mxu1 %v960_v0 }
  0x7d   :  { %668 = vmatprep.mubr.msk.f32.mxu0 %vm961_vm0, %v962_v1  ;;  %756 = vmatpush3.bf16.msra.mxu0 %v755_v53 }
  0x7e   :  { %757 = vmatprep.subr.bf16.mxu0 %v960_v0 }
  0x81   :  { %759 = vmatpush3.bf16.msra.mxu0 %v758_v56 }
  0x82   :  { %760 = vmatprep.subr.bf16.mxu0 %v960_v0 }
  0x85   :  { %762 = vmatpush3.bf16.msra.mxu0 %v761_v59 }
  0x86   :  { %763 = vmatprep.subr.bf16.mxu0 %v960_v0 }
  0x89   :  { %765 = vmatpush3.bf16.msra.mxu0 %v764_v62 }
  0x8a   :  { %766 = vmatprep.subr.bf16.mxu0 %v960_v0 }
  0x8d   :  { %768 = vmatpush3.bf16.msra.mxu0 %v767_v3 }
  0x8e   :  { %769 = vmatprep.subr.bf16.mxu0 %v960_v0 }
  0x91   :  { %771 = vmatpush3.bf16.msra.mxu0 %v770_v6 }
  0x92   :  { %772 = vmatprep.subr.bf16.mxu0 %v960_v0 }
  0x95   :  { %774 = vmatpush3.bf16.msra.mxu0 %v773_v9 }
  0x96   :  { %775 = vmatprep.subr.bf16.mxu0 %v960_v0 }
  0x99   :  { %777 = vmatpush3.bf16.msra.mxu0 %v776_v37 }
 0x14f   :  { %v189_v13 = vpop.f32.mrb[0].mxu0 }
 0x150   :  { %v190_v14 = vadd.f32 %v494_v10, %v189_v13  ;;  %v600_v15 = vpop.f32.mrb[1].mxu0 }
 0x152   :  { %v193_v17 = vmax.f32 %v190_v14, 0.0 }
 0x154   :  { %634 = vmatmul.mubr.f32.vlgmr.msra.gmra.mrb[0].mxu1 %v193_v17 }
 0x155   :  { %780 = vmatpush3.bf16.msra.mxu1 %v779_v16  ;;  %703 = vmatprep.mubr.msk.f32.mxu1 %vm961_vm0, %v962_v1  ;;  %v392_v1 = vld [vmem:[#allocation10 + $0x50] sm:$0xff] }
 0x156   :  { %781 = vmatprep.subr.bf16.mxu1 %v960_v0  ;;  %v794_v31 = vpack.c.bf16 %v393_v30, %v392_v1 }
 0x159   :  { %783 = vmatpush3.bf16.msra.mxu1 %v782_v20 }
 0x15a   :  { %784 = vmatprep.subr.bf16.mxu1 %v960_v0 }
 0x15d   :  { %786 = vmatpush3.bf16.msra.mxu1 %v785_v23 }
 0x15e   :  { %787 = vmatprep.subr.bf16.mxu1 %v960_v0 }
 0x161   :  { %789 = vmatpush3.bf16.msra.mxu1 %v788_v26 }
 0x162   :  { %790 = vmatprep.subr.bf16.mxu1 %v960_v0 }
 0x165   :  { %792 = vmatpush3.bf16.msra.mxu1 %v791_v29 }
 0x166   :  { %793 = vmatprep.subr.bf16.mxu1 %v960_v0 }
 0x169   :  { %795 = vmatpush3.bf16.msra.mxu1 %v794_v31 }
 0x16a   :  { %796 = vmatprep.subr.bf16.mxu1 %v960_v0 }
 0x16d   :  { %798 = vmatpush3.bf16.msra.mxu1 %v797_v34 }
 0x16e   :  { %799 = vmatprep.subr.bf16.mxu1 %v960_v0 }
 0x171   :  { %801 = vmatpush3.bf16.msra.mxu1 %v800_v40 }
 0x174   :  { %704 = vmatmul.mubr.f32.vlgmr.msra.gmra.mrb[2].mxu1 %v1105_v47 }
 0x227   :  { %v283_v42 = vpop.f32.mrb[0].mxu1 }
 0x228   :  { %v284_v43 = vadd.f32 %v495_v41, %v283_v42  ;;  %v635_v44 = vpop.f32.mrb[1].mxu1 }
 0x22a   :  { %v287_v45 = vmax.f32 %v284_v43, 0.0 }
 0x22c   :  { %669 = vmatmul.mubr.f32.vlgmr.msra.gmra.mrb[2].mxu0 %v287_v45 }
 0x247   :  { %v471_v0 = vpop.f32.mrb[2].mxu1 }
 0x248   :  { %v705_v46 = vpop.f32.mrb[3].mxu1  ;;  %v472_v52 = vadd.f32 %v497_v49, %v471_v0 }
 0x2ff   :  { %v377_v47 = vpop.f32.mrb[2].mxu0 }
 0x300   :  { %v378_v50 = vadd.f32 %v496_v48, %v377_v47  ;;  %v670_v51 = vpop.f32.mrb[3].mxu0 }
 0x302   :  { %v381_v53 = vmax.f32 %v378_v50, 0.0 }
 0x304   :  { %v475_v54 = vadd.f32 %v472_v52, %v381_v53 }
 0x306   :  { %476 = vst [vmem:[#allocation11] sm:$0xff] %v475_v54 }
 0x307   :  { %934 = shalt.err (!%p931_p2)
}
 0x308   :  { %s935_s8 = scalar_lea.hbm %s1163_s9, 128 }
 0x309   :  { %p936_p3 = scmp.ne.s32.totalorder %s1163_s9, %s935_s8  ;;  %p939_p4 = scmp.lt.u32.totalorder %s935_s8, %s1163_s9 }
 0x30b   :  { %p941_p5 = pnand %p939_p4, %p936_p3 }
 0x30d   :  { %944 = shalt.err (!%p941_p5)
}
 0x30e   :  { %486 = dma.vmem_to_hbm [thread:$0]  %s484_s12, 128, %s1163_s9, [#allocation4]  }
 0x30f   :  { %951 = dma.done.wait [#allocation4], 128  }
 0x310   :  { %952 = vsyncadd [#allocation4], 4294967168 }
 0x311   :  { %490 = vsyncpa [#allocation3], 1 }
 0x312   :  { %491 = vsyncpa [#allocation6], 1 }
 0x313   :  { %492 = vsyncpa [#allocation9], 1 }
 0x314   :  { %493 = vsyncpa [#allocation4], 1 }

</bundles_post_ra>
